<compile_context>
chip_gen: v7x
topology: tpu7x:2x2x1
jax: 0.10.0
libtpu: 0.0.40
codegen_flags: <defaults>
</compile_context>

<pallas_src>
import jax
import jax.numpy as jnp
from jax import lax
from jax.experimental import pallas as pl
from jax.experimental.pallas import tpu as pltpu


def _round_up(x, m):
    return ((x + m - 1) // m) * m


def _triplet_fused_kernel(x1_ref, x2_ref, x3_ref, we_ref, be_ref, wc_ref, bc_ref,
                          n1_ref, n2_ref, n3_ref, clf_ref):
    """One batch tile: embed + l2-normalize x1/x2/x3, classify x1. All in VMEM.

    x1/x2/x3: (TB, D)  f32   flattened inputs (cast to bf16 on the VPU here)
    we:       (D, HP)  bf16  embedding weight (H zero-padded to 128 lanes)
    be:       (1, HP)  f32   embedding bias
    wc:       (HP, CP) bf16  classifier weight (C zero-padded to 128 lanes)
    bc:       (1, CP)  f32   classifier bias
    n1/n2/n3: (TB, HP) bf16  l2-normalized embeddings
    clf:      (TB, CP) f32   classifier logits (x1 rows only)
    """
    we = we_ref[...]
    be = be_ref[...]

    def embed(x_f32):
        # bf16 cast on the VPU: HBM sees a single f32 read of the activations.
        emb = jnp.dot(x_f32.astype(jnp.bfloat16), we,
                      preferred_element_type=jnp.float32) + be
        # l2normalize: feature * rsqrt(sum(feature**2, dim=1, keepdim=True)).
        # Padded lanes are exactly zero (zero weight + zero bias), so the sum
        # equals the unpadded-H sum.  The ssum>0 guard only changes all-zero
        # (batch-padding) rows: 0 instead of the NaN PyTorch would produce for
        # a genuinely-zero embedding row.
        ssum = jnp.sum(emb * emb, axis=1, keepdims=True)
        inv = jnp.where(ssum > 0.0, lax.rsqrt(ssum), 0.0)
        return emb, emb * inv

    emb1, n1 = embed(x1_ref[...])
    _, n2 = embed(x2_ref[...])
    _, n3 = embed(x3_ref[...])
    n1_ref[...] = n1.astype(n1_ref.dtype)
    n2_ref[...] = n2.astype(n2_ref.dtype)
    n3_ref[...] = n3.astype(n3_ref.dtype)
    # clf_net(x1): Linear on the *unnormalized* embedding of x1 only.
    clf_ref[...] = (
        jnp.dot(emb1.astype(jnp.bfloat16), wc_ref[...],
                preferred_element_type=jnp.float32) + bc_ref[...]
    )


def _pick_tile_b(b_rows, d, hp, cp, block_budget_bytes):
    """Largest batch tile whose double-buffered blocks fit the VMEM budget."""
    per_row = 2 * 3 * d * 4 + 2 * (3 * hp * 2 + cp * 4)     # ins + outs per row
    fixed = 2 * (d * hp * 2 + hp * 4 + hp * cp * 2 + cp * 4)  # resident weights
    avail = max(block_budget_bytes - fixed, per_row * 8)
    tile = max(8, (avail // per_row) // 8 * 8)
    tile = min(tile, 512)            # v7x-safe cap (64 MiB VMEM per TensorCore)
    tile = min(tile, b_rows)
    # Prefer >=2 grid steps so dimension_semantics=("parallel",) can shard the
    # batch across v7x's 2 TensorCores (no effect on v5e/v6e).
    if b_rows >= 16 and tile >= b_rows:
        tile = _round_up(-(-b_rows // 2), 8)
    return tile


@jax.jit
def triplet_net_forward(x1, x2, x3, params):
    """Replicates TripletNet.forward(x1, x2, x3) in one Pallas launch."""
    w_emb, b_emb, w_clf, b_clf = params
    B = x1.shape[0]
    D, H = w_emb.shape
    C = w_clf.shape[1]
    HP = _round_up(H, 128)
    CP = _round_up(C, 128)

    # Flatten NCHW -> (B, D): a pure row-major reshape (matches torch .view),
    # no HBM copy.  No concat / host bf16 cast / activation lane padding.
    f1 = x1.reshape(B, -1)
    f2 = x2.reshape(B, -1)
    f3 = x3.reshape(B, -1)

    tile_b = _pick_tile_b(_round_up(B, 8), D, HP, CP, 20 * 1024 * 1024)
    B_pad = _round_up(_round_up(B, 8), tile_b)
    if B_pad != B:
        # Only hit when B is not already a tile multiple (e.g. tiny demo batch).
        pad = ((0, B_pad - B), (0, 0))
        f1 = jnp.pad(f1, pad)
        f2 = jnp.pad(f2, pad)
        f3 = jnp.pad(f3, pad)

    # Thin weight dims zero-padded to 128 lanes (exact math, lane-dense stores);
    # both MXU weights shipped as bf16, biases stay f32.
    w_emb_p = jnp.pad(w_emb, ((0, 0), (0, HP - H))).astype(jnp.bfloat16)
    b_emb_p = jnp.pad(b_emb, ((0, 0), (0, HP - H)))
    w_clf_p = jnp.pad(w_clf, ((0, HP - H), (0, CP - C))).astype(jnp.bfloat16)
    b_clf_p = jnp.pad(b_clf, ((0, 0), (0, CP - C)))

    grid = (B_pad // tile_b,)

    flops = 3 * 2 * B_pad * D * HP + 2 * B_pad * HP * CP + 9 * B_pad * HP
    bytes_accessed = (
        3 * B_pad * D * 4
        + w_emb_p.size * 2 + b_emb_p.size * 4
        + w_clf_p.size * 2 + b_clf_p.size * 4
        + 3 * B_pad * HP * 2 + B_pad * CP * 4
    )
    vmem_blocks = (
        2 * 3 * tile_b * D * 4
        + 2 * (D * HP * 2 + HP * 4 + HP * CP * 2 + CP * 4)
        + 2 * (3 * tile_b * HP * 2 + tile_b * CP * 4)
    )
    vmem_limit = int(min(vmem_blocks + (8 << 20), 48 << 20))

    n1, n2, n3, clf = pl.pallas_call(
        _triplet_fused_kernel,
        out_shape=(
            jax.ShapeDtypeStruct((B_pad, HP), jnp.bfloat16),
            jax.ShapeDtypeStruct((B_pad, HP), jnp.bfloat16),
            jax.ShapeDtypeStruct((B_pad, HP), jnp.bfloat16),
            jax.ShapeDtypeStruct((B_pad, CP), jnp.float32),
        ),
        grid=grid,
        in_specs=[
            pl.BlockSpec((tile_b, D), lambda i: (i, 0)),   # x1 tile
            pl.BlockSpec((tile_b, D), lambda i: (i, 0)),   # x2 tile
            pl.BlockSpec((tile_b, D), lambda i: (i, 0)),   # x3 tile
            pl.BlockSpec((D, HP), lambda i: (0, 0)),       # weights stay resident
            pl.BlockSpec((1, HP), lambda i: (0, 0)),
            pl.BlockSpec((HP, CP), lambda i: (0, 0)),
            pl.BlockSpec((1, CP), lambda i: (0, 0)),
        ],
        out_specs=(
            pl.BlockSpec((tile_b, HP), lambda i: (i, 0)),
            pl.BlockSpec((tile_b, HP), lambda i: (i, 0)),
            pl.BlockSpec((tile_b, HP), lambda i: (i, 0)),
            pl.BlockSpec((tile_b, CP), lambda i: (i, 0)),
        ),
        compiler_params=pltpu.CompilerParams(
            dimension_semantics=("parallel",),
            vmem_limit_bytes=vmem_limit),
        cost_estimate=pl.CostEstimate(
            flops=flops, transcendentals=3 * B_pad,
            bytes_accessed=bytes_accessed),
    )(f1, f2, f3, w_emb_p, b_emb_p, w_clf_p, b_clf_p)

    # Tiny slice+cast back to f32 for the caller (reads only the real B x H /
    # B x C region of the lane-dense kernel outputs).
    out1 = n1[:B, :H].astype(jnp.float32)
    out2 = n2[:B, :H].astype(jnp.float32)
    out3 = n3[:B, :H].astype(jnp.float32)
    out4 = clf[:B, :C]
    return out1, out2, out3, out4


def make_params(key, in_features, num_hidden, num_classes):
    k1, k2, k3, k4 = jax.random.split(key, 4)
    w_emb = jax.random.normal(k1, (in_features, num_hidden), jnp.float32) * 0.02
    b_emb = jax.random.normal(k2, (1, num_hidden), jnp.float32) * 0.01
    w_clf = jax.random.normal(k3, (num_hidden, num_classes), jnp.float32) * 0.1
    b_clf = jax.random.normal(k4, (1, num_classes), jnp.float32) * 0.01
    return w_emb, b_emb, w_clf, b_clf


if __name__ == "__main__":
    # Small synthetic shapes consistent with an NCHW EEG-style input.
    B, C, H, W = 2, 4, 16, 16
    D = C * H * W          # 1024 flattened features
    NUM_HIDDEN = 32
    NUM_CLASSES = 4

    key = jax.random.PRNGKey(0)
    kx1, kx2, kx3, kp = jax.random.split(key, 4)
    x1 = jax.random.normal(kx1, (B, C, H, W), jnp.float32)
    x2 = jax.random.normal(kx2, (B, C, H, W), jnp.float32)
    x3 = jax.random.normal(kx3, (B, C, H, W), jnp.float32)
    params = make_params(kp, D, NUM_HIDDEN, NUM_CLASSES)

    out1, out2, out3, out4 = triplet_net_forward(x1, x2, x3, params)
    jax.block_until_ready((out1, out2, out3, out4))

    # Sanity checks vs. an f32 reference (tolerances cover the bf16 MXU path
    # and the bf16 embedding store).
    def ref_emb(x):
        e = x.reshape(B, -1) @ params[0] + params[1]
        return e / jnp.sqrt(jnp.sum(e * e, axis=1, keepdims=True))

    assert jnp.allclose(out1, ref_emb(x1), atol=2e-2, rtol=2e-2)
    assert jnp.allclose(out2, ref_emb(x2), atol=2e-2, rtol=2e-2)
    assert jnp.allclose(out3, ref_emb(x3), atol=2e-2, rtol=2e-2)
    ref4 = (x1.reshape(B, -1) @ params[0] + params[1]) @ params[2] + params[3]
    assert jnp.allclose(out4, ref4, atol=3e-2, rtol=3e-2)
    # l2 norms of outputs 1-3 should be ~1 per row (bf16 store => ~1e-2 slack).
    assert jnp.allclose(jnp.sum(out1 * out1, axis=1), 1.0, atol=1e-2)

    print("KERNEL_OK")
</pallas_src>

<mosaic_0001>
module attributes {stable_mosaic.version = 11 : i64} {
  func.func @_triplet_fused_kernel(%arg0: i32, %arg1: memref<8x1024xf32, #tpu.memory_space<vmem>>, %arg2: memref<8x1024xf32, #tpu.memory_space<vmem>>, %arg3: memref<8x1024xf32, #tpu.memory_space<vmem>>, %arg4: memref<1024x128xbf16, #tpu.memory_space<vmem>>, %arg5: memref<1x128xf32, #tpu.memory_space<vmem>>, %arg6: memref<128x128xbf16, #tpu.memory_space<vmem>>, %arg7: memref<1x128xf32, #tpu.memory_space<vmem>>, %arg8: memref<8x128xbf16, #tpu.memory_space<vmem>>, %arg9: memref<8x128xbf16, #tpu.memory_space<vmem>>, %arg10: memref<8x128xbf16, #tpu.memory_space<vmem>>, %arg11: memref<8x128xf32, #tpu.memory_space<vmem>>) attributes {dimension_semantics = [#tpu.dimension_semantics<parallel>], iteration_bounds = array<i64: 1>, scalar_prefetch = 0 : i64, scratch_operands = 0 : i64, tpu.core_type = #tpu.core_type<tc>, window_params = [{transform_indices = @transform_0, window_bounds = array<i64: 8, 1024>}, {transform_indices = @transform_1, window_bounds = array<i64: 8, 1024>}, {transform_indices = @transform_2, window_bounds = array<i64: 8, 1024>}, {pipeline_mode = #tpu.pipeline_mode<synchronous>, transform_indices = @transform_3, window_bounds = array<i64: 1024, 128>}, {pipeline_mode = #tpu.pipeline_mode<synchronous>, transform_indices = @transform_4, window_bounds = array<i64: 1, 128>}, {pipeline_mode = #tpu.pipeline_mode<synchronous>, transform_indices = @transform_5, window_bounds = array<i64: 128, 128>}, {pipeline_mode = #tpu.pipeline_mode<synchronous>, transform_indices = @transform_6, window_bounds = array<i64: 1, 128>}, {transform_indices = @transform_7, window_bounds = array<i64: 8, 128>}, {transform_indices = @transform_8, window_bounds = array<i64: 8, 128>}, {transform_indices = @transform_9, window_bounds = array<i64: 8, 128>}, {transform_indices = @transform_10, window_bounds = array<i64: 8, 128>}]} {
    %c0 = arith.constant 0 : index
    %c0_0 = arith.constant 0 : index
    %0 = vector.load %arg4[%c0, %c0_0] : memref<1024x128xbf16, #tpu.memory_space<vmem>>, vector<1024x128xbf16>
    %c0_1 = arith.constant 0 : index
    %c0_2 = arith.constant 0 : index
    %1 = vector.load %arg5[%c0_1, %c0_2] : memref<1x128xf32, #tpu.memory_space<vmem>>, vector<1x128xf32>
    %c0_3 = arith.constant 0 : index
    %c0_4 = arith.constant 0 : index
    %2 = vector.load %arg1[%c0_3, %c0_4] : memref<8x1024xf32, #tpu.memory_space<vmem>>, vector<8x1024xf32>
    %3 = arith.truncf %2 : vector<8x1024xf32> to vector<8x1024xbf16>
    %cst = arith.constant dense<0.000000e+00> : vector<8x128xf32>
    %4 = tpu.matmul %3, %0, %cst {dimension_numbers = #tpu.dot_dimension_numbers<[1], [0], [0], [1], [0, 0, 1, 1], [], []>} : vector<8x1024xbf16>, vector<1024x128xbf16>, vector<8x128xf32> -> vector<8x128xf32>
    %5 = vector.broadcast %1 : vector<1x128xf32> to vector<8x128xf32>
    %6 = arith.addf %4, %5 : vector<8x128xf32>
    %7 = arith.mulf %6, %6 : vector<8x128xf32>
    %cst_5 = arith.constant dense<0.000000e+00> : vector<8xf32>
    %8 = vector.multi_reduction <add>, %7, %cst_5 [1] : vector<8x128xf32> to vector<8xf32>
    %9 = vector.shape_cast %8 : vector<8xf32> to vector<8x1xf32>
    %cst_6 = arith.constant 0.000000e+00 : f32
    %10 = vector.broadcast %cst_6 : f32 to vector<8x1xf32>
    %11 = arith.cmpf ogt, %9, %10 : vector<8x1xf32>
    %12 = math.rsqrt %9 : vector<8x1xf32>
    %cst_7 = arith.constant 0.000000e+00 : f32
    %13 = vector.broadcast %cst_7 : f32 to vector<8x1xf32>
    %14 = arith.select %11, %12, %13 : vector<8x1xi1>, vector<8x1xf32>
    %15 = vector.broadcast %14 : vector<8x1xf32> to vector<8x128xf32>
    %16 = arith.mulf %6, %15 : vector<8x128xf32>
    %c0_8 = arith.constant 0 : index
    %c0_9 = arith.constant 0 : index
    %17 = vector.load %arg2[%c0_8, %c0_9] : memref<8x1024xf32, #tpu.memory_space<vmem>>, vector<8x1024xf32>
    %18 = arith.truncf %17 : vector<8x1024xf32> to vector<8x1024xbf16>
    %cst_10 = arith.constant dense<0.000000e+00> : vector<8x128xf32>
    %19 = tpu.matmul %18, %0, %cst_10 {dimension_numbers = #tpu.dot_dimension_numbers<[1], [0], [0], [1], [0, 0, 1, 1], [], []>} : vector<8x1024xbf16>, vector<1024x128xbf16>, vector<8x128xf32> -> vector<8x128xf32>
    %20 = vector.broadcast %1 : vector<1x128xf32> to vector<8x128xf32>
    %21 = arith.addf %19, %20 : vector<8x128xf32>
    %22 = arith.mulf %21, %21 : vector<8x128xf32>
    %cst_11 = arith.constant dense<0.000000e+00> : vector<8xf32>
    %23 = vector.multi_reduction <add>, %22, %cst_11 [1] : vector<8x128xf32> to vector<8xf32>
    %24 = vector.shape_cast %23 : vector<8xf32> to vector<8x1xf32>
    %cst_12 = arith.constant 0.000000e+00 : f32
    %25 = vector.broadcast %cst_12 : f32 to vector<8x1xf32>
    %26 = arith.cmpf ogt, %24, %25 : vector<8x1xf32>
    %27 = math.rsqrt %24 : vector<8x1xf32>
    %cst_13 = arith.constant 0.000000e+00 : f32
    %28 = vector.broadcast %cst_13 : f32 to vector<8x1xf32>
    %29 = arith.select %26, %27, %28 : vector<8x1xi1>, vector<8x1xf32>
    %30 = vector.broadcast %29 : vector<8x1xf32> to vector<8x128xf32>
    %31 = arith.mulf %21, %30 : vector<8x128xf32>
    %c0_14 = arith.constant 0 : index
    %c0_15 = arith.constant 0 : index
    %32 = vector.load %arg3[%c0_14, %c0_15] : memref<8x1024xf32, #tpu.memory_space<vmem>>, vector<8x1024xf32>
    %33 = arith.truncf %32 : vector<8x1024xf32> to vector<8x1024xbf16>
    %cst_16 = arith.constant dense<0.000000e+00> : vector<8x128xf32>
    %34 = tpu.matmul %33, %0, %cst_16 {dimension_numbers = #tpu.dot_dimension_numbers<[1], [0], [0], [1], [0, 0, 1, 1], [], []>} : vector<8x1024xbf16>, vector<1024x128xbf16>, vector<8x128xf32> -> vector<8x128xf32>
    %35 = vector.broadcast %1 : vector<1x128xf32> to vector<8x128xf32>
    %36 = arith.addf %34, %35 : vector<8x128xf32>
    %37 = arith.mulf %36, %36 : vector<8x128xf32>
    %cst_17 = arith.constant dense<0.000000e+00> : vector<8xf32>
    %38 = vector.multi_reduction <add>, %37, %cst_17 [1] : vector<8x128xf32> to vector<8xf32>
    %39 = vector.shape_cast %38 : vector<8xf32> to vector<8x1xf32>
    %cst_18 = arith.constant 0.000000e+00 : f32
    %40 = vector.broadcast %cst_18 : f32 to vector<8x1xf32>
    %41 = arith.cmpf ogt, %39, %40 : vector<8x1xf32>
    %42 = math.rsqrt %39 : vector<8x1xf32>
    %cst_19 = arith.constant 0.000000e+00 : f32
    %43 = vector.broadcast %cst_19 : f32 to vector<8x1xf32>
    %44 = arith.select %41, %42, %43 : vector<8x1xi1>, vector<8x1xf32>
    %45 = vector.broadcast %44 : vector<8x1xf32> to vector<8x128xf32>
    %46 = arith.mulf %36, %45 : vector<8x128xf32>
    %47 = arith.truncf %16 : vector<8x128xf32> to vector<8x128xbf16>
    %c0_20 = arith.constant 0 : index
    %c0_21 = arith.constant 0 : index
    %48 = vector.load %arg8[%c0_20, %c0_21] : memref<8x128xbf16, #tpu.memory_space<vmem>>, vector<8x128xbf16>
    tpu.vector_store %arg8[%c0_20, %c0_21], %47 {strides = array<i32>} : memref<8x128xbf16, #tpu.memory_space<vmem>>, vector<8x128xbf16>,
    %49 = arith.truncf %31 : vector<8x128xf32> to vector<8x128xbf16>
    %c0_22 = arith.constant 0 : index
    %c0_23 = arith.constant 0 : index
    %50 = vector.load %arg9[%c0_22, %c0_23] : memref<8x128xbf16, #tpu.memory_space<vmem>>, vector<8x128xbf16>
    tpu.vector_store %arg9[%c0_22, %c0_23], %49 {strides = array<i32>} : memref<8x128xbf16, #tpu.memory_space<vmem>>, vector<8x128xbf16>,
    %51 = arith.truncf %46 : vector<8x128xf32> to vector<8x128xbf16>
    %c0_24 = arith.constant 0 : index
    %c0_25 = arith.constant 0 : index
    %52 = vector.load %arg10[%c0_24, %c0_25] : memref<8x128xbf16, #tpu.memory_space<vmem>>, vector<8x128xbf16>
    tpu.vector_store %arg10[%c0_24, %c0_25], %51 {strides = array<i32>} : memref<8x128xbf16, #tpu.memory_space<vmem>>, vector<8x128xbf16>,
    %53 = arith.truncf %6 : vector<8x128xf32> to vector<8x128xbf16>
    %c0_26 = arith.constant 0 : index
    %c0_27 = arith.constant 0 : index
    %54 = vector.load %arg6[%c0_26, %c0_27] : memref<128x128xbf16, #tpu.memory_space<vmem>>, vector<128x128xbf16>
    %cst_28 = arith.constant dense<0.000000e+00> : vector<8x128xf32>
    %55 = tpu.matmul %53, %54, %cst_28 {dimension_numbers = #tpu.dot_dimension_numbers<[1], [0], [0], [1], [0, 0, 1, 1], [], []>} : vector<8x128xbf16>, vector<128x128xbf16>, vector<8x128xf32> -> vector<8x128xf32>
    %c0_29 = arith.constant 0 : index
    %c0_30 = arith.constant 0 : index
    %56 = vector.load %arg7[%c0_29, %c0_30] : memref<1x128xf32, #tpu.memory_space<vmem>>, vector<1x128xf32>
    %57 = vector.broadcast %56 : vector<1x128xf32> to vector<8x128xf32>
    %58 = arith.addf %55, %57 : vector<8x128xf32>
    %c0_31 = arith.constant 0 : index
    %c0_32 = arith.constant 0 : index
    %59 = vector.load %arg11[%c0_31, %c0_32] : memref<8x128xf32, #tpu.memory_space<vmem>>, vector<8x128xf32>
    tpu.vector_store %arg11[%c0_31, %c0_32], %58 {strides = array<i32>} : memref<8x128xf32, #tpu.memory_space<vmem>>, vector<8x128xf32>,
    return
  }
  func.func @transform_0(%arg0: i32) -> (i32, i32) {
    %c0_i32 = arith.constant 0 : i32
    %c0_i32_0 = arith.constant 0 : i32
    return %arg0, %c0_i32 : i32, i32
  }
  func.func @transform_1(%arg0: i32) -> (i32, i32) {
    %c0_i32 = arith.constant 0 : i32
    %c0_i32_0 = arith.constant 0 : i32
    return %arg0, %c0_i32 : i32, i32
  }
  func.func @transform_2(%arg0: i32) -> (i32, i32) {
    %c0_i32 = arith.constant 0 : i32
    %c0_i32_0 = arith.constant 0 : i32
    return %arg0, %c0_i32 : i32, i32
  }
  func.func @transform_3(%arg0: i32) -> (i32, i32) {
    %c0_i32 = arith.constant 0 : i32
    %c0_i32_0 = arith.constant 0 : i32
    %c0_i32_1 = arith.constant 0 : i32
    return %c0_i32, %c0_i32_0 : i32, i32
  }
  func.func @transform_4(%arg0: i32) -> (i32, i32) {
    %c0_i32 = arith.constant 0 : i32
    %c0_i32_0 = arith.constant 0 : i32
    %c0_i32_1 = arith.constant 0 : i32
    return %c0_i32, %c0_i32_0 : i32, i32
  }
  func.func @transform_5(%arg0: i32) -> (i32, i32) {
    %c0_i32 = arith.constant 0 : i32
    %c0_i32_0 = arith.constant 0 : i32
    %c0_i32_1 = arith.constant 0 : i32
    return %c0_i32, %c0_i32_0 : i32, i32
  }
  func.func @transform_6(%arg0: i32) -> (i32, i32) {
    %c0_i32 = arith.constant 0 : i32
    %c0_i32_0 = arith.constant 0 : i32
    %c0_i32_1 = arith.constant 0 : i32
    return %c0_i32, %c0_i32_0 : i32, i32
  }
  func.func @transform_7(%arg0: i32) -> (i32, i32) {
    %c0_i32 = arith.constant 0 : i32
    %c0_i32_0 = arith.constant 0 : i32
    return %arg0, %c0_i32 : i32, i32
  }
  func.func @transform_8(%arg0: i32) -> (i32, i32) {
    %c0_i32 = arith.constant 0 : i32
    %c0_i32_0 = arith.constant 0 : i32
    return %arg0, %c0_i32 : i32, i32
  }
  func.func @transform_9(%arg0: i32) -> (i32, i32) {
    %c0_i32 = arith.constant 0 : i32
    %c0_i32_0 = arith.constant 0 : i32
    return %arg0, %c0_i32 : i32, i32
  }
  func.func @transform_10(%arg0: i32) -> (i32, i32) {
    %c0_i32 = arith.constant 0 : i32
    %c0_i32_0 = arith.constant 0 : i32
    return %arg0, %c0_i32 : i32, i32
  }
}

</mosaic_0001>

<bundles_post_ra>
// kernel: triplet_net_forward.1
= control target key start
LH: loop header
LB: loop body
LE: loop exit
PB: predicated region body
PF: predicated region fallthrough
CT: control target
= control target key end

     0   :  { %vm1682_vm0 = vmmov 0   ;;  %s2364_s3 = inlined_call_operand.vmem [shape: bf16[1024,128], index: 3, kind: input, shape index: {}]   ;;  %s2365_s0 = inlined_call_operand.vmem [shape: f32[8,1024], index: 0, kind: input, shape index: {}]   ;;  %s2366_s1 = inlined_call_operand.vmem [shape: f32[8,1024], index: 1, kind: input, shape index: {}]   ;;  %s2367_s5 = inlined_call_operand.vmem [shape: bf16[128,128], index: 5, kind: input, shape index: {}]   ;;  %s2368_s2 = inlined_call_operand.vmem [shape: f32[8,1024], index: 2, kind: input, shape index: {}]   ;;  %s2369_s4 = inlined_call_operand.vmem [shape: f32[1,128], index: 4, kind: input, shape index: {}]   ;;  %s2370_s7 = inlined_call_operand.vmem [shape: bf16[8,128], index: 7, kind: output, shape index: {0}]   ;;  %s2371_s6 = inlined_call_operand.vmem [shape: f32[1,128], index: 6, kind: input, shape index: {}]   ;;  %s2372_s10 = inlined_call_operand.vmem [shape: f32[8,128], index: 10, kind: output, shape index: {3}]   ;;  %s2373_s8 = inlined_call_operand.vmem [shape: bf16[8,128], index: 8, kind: output, shape index: {1}]   ;;  %s2374_s9 = inlined_call_operand.vmem [shape: bf16[8,128], index: 9, kind: output, shape index: {2}]  }
   0x1   :  { %v1741_v0 = vld [vmem:[%s2364_s3 + $0x40] sm:$0xff]   ;;  %v1764_v4 = vld [vmem:[%s2364_s3 + $0x48] sm:$0xff]   ;;  %v1788_v8 = vld [vmem:[%s2364_s3 + $0x50] sm:$0xff]  }
   0x2   :  { %v1746_v1 = vld [vmem:[%s2364_s3 + $0xc0] sm:$0xff]   ;;  %1308 = vmatprep.subr.bf16.mxu0 %v1741_v0  ;;  %v1770_v5 = vld [vmem:[%s2364_s3 + $0xc8] sm:$0xff]   ;;  %v1794_v9 = vld [vmem:[%s2364_s3 + $0xd0] sm:$0xff]  }
   0x3   :  { %v1752_v2 = vld [vmem:[%s2364_s3] sm:$0xff]   ;;  %1330 = vmatprep.subr.bf16.mxu1 %v1746_v1  ;;  %v1776_v6 = vld [vmem:[%s2364_s3 + $0x8] sm:$0xff]   ;;  %v1800_v10 = vld [vmem:[%s2364_s3 + $0x10] sm:$0xff]  }
   0x4   :  { %v1758_v3 = vld [vmem:[%s2364_s3 + $0x80] sm:$0xff]   ;;  %1309 = vmatpush3.bf16.msra.mxu0 %v1752_v2  ;;  %v1782_v7 = vld [vmem:[%s2364_s3 + $0x88] sm:$0xff]   ;;  %v1806_v11 = vld [vmem:[%s2364_s3 + $0x90] sm:$0xff]  }
   0x5   :  { %1331 = vmatpush3.bf16.msra.mxu1 %v1758_v3  ;;  %1310 = vmatprep.subr.bf16.mxu0 %v1764_v4  ;;  %v1812_v12 = vld [vmem:[%s2364_s3 + $0x58] sm:$0xff]   ;;  %v1836_v16 = vld [vmem:[%s2364_s3 + $0x60] sm:$0xff]   ;;  %v1860_v20 = vld [vmem:[%s2364_s3 + $0x68] sm:$0xff]  }
   0x6   :  { %1332 = vmatprep.subr.bf16.mxu1 %v1770_v5  ;;  %v1818_v13 = vld [vmem:[%s2364_s3 + $0xd8] sm:$0xff]   ;;  %v1842_v17 = vld [vmem:[%s2364_s3 + $0xe0] sm:$0xff]   ;;  %v1866_v21 = vld [vmem:[%s2364_s3 + $0xe8] sm:$0xff]  }
   0x7   :  { %v1824_v14 = vld [vmem:[%s2364_s3 + $0x18] sm:$0xff]   ;;  %v1848_v18 = vld [vmem:[%s2364_s3 + $0x20] sm:$0xff]   ;;  %v1872_v22 = vld [vmem:[%s2364_s3 + $0x28] sm:$0xff]  }
   0x8   :  { %1311 = vmatpush3.bf16.msra.mxu0 %v1776_v6  ;;  %v1830_v15 = vld [vmem:[%s2364_s3 + $0x98] sm:$0xff]   ;;  %v1854_v19 = vld [vmem:[%s2364_s3 + $0xa0] sm:$0xff]   ;;  %v1878_v23 = vld [vmem:[%s2364_s3 + $0xa8] sm:$0xff]  }
   0x9   :  { %1333 = vmatpush3.bf16.msra.mxu1 %v1782_v7  ;;  %1312 = vmatprep.subr.bf16.mxu0 %v1788_v8  ;;  %v1884_v24 = vld [vmem:[%s2364_s3 + $0x70] sm:$0xff]   ;;  %v1908_v28 = vld [vmem:[%s2364_s3 + $0x78] sm:$0xff]   ;;  %v161_v32 = vld [vmem:[%s2365_s0 + $0x8] sm:$0xff] }
   0xa   :  { %1334 = vmatprep.subr.bf16.mxu1 %v1794_v9  ;;  %v1890_v25 = vld [vmem:[%s2364_s3 + $0xf0] sm:$0xff]   ;;  %v1914_v29 = vld [vmem:[%s2364_s3 + $0xf8] sm:$0xff]   ;;  %v160_v34 = vld [vmem:[%s2365_s0] sm:$0xff]  ;;  %v169_v35 = vpack.c.bf16 %v161_v32, %v161_v32 }
   0xb   :  { %v1896_v26 = vld [vmem:[%s2364_s3 + $0x30] sm:$0xff]   ;;  %v1920_v30 = vld [vmem:[%s2364_s3 + $0x38] sm:$0xff]   ;;  %v168_v37 = vpack.c.bf16 %v160_v34, %v160_v34  ;;  %v1945_v40 = vld [vmem:[%s2364_s3 + $0x140] sm:$0xff]  }
   0xc   :  { %1313 = vmatpush3.bf16.msra.mxu0 %v1800_v10  ;;  %v1902_v27 = vld [vmem:[%s2364_s3 + $0xb0] sm:$0xff]   ;;  %v1926_v31 = vld [vmem:[%s2364_s3 + $0xb8] sm:$0xff]   ;;  %598 = vmatprep.mubr.bf16.mxu0 %v169_v35  ;;  %v1950_v41 = vld [vmem:[%s2364_s3 + $0x1c0] sm:$0xff]  }
   0xd   :  { %1335 = vmatpush3.bf16.msra.mxu1 %v1806_v11  ;;  %1314 = vmatprep.subr.bf16.mxu0 %v1812_v12  ;;  %v163_v33 = vld [vmem:[%s2365_s0 + $0x18] sm:$0xff]  ;;  %v162_v38 = vld [vmem:[%s2365_s0 + $0x10] sm:$0xff]  ;;  %v1955_v42 = vld [vmem:[%s2364_s3 + $0x100] sm:$0xff]  }
   0xe   :  { %1336 = vmatprep.subr.bf16.mxu1 %v1818_v13  ;;  %v171_v36 = vpack.c.bf16 %v163_v33, %v163_v33  ;;  %v170_v39 = vpack.c.bf16 %v162_v38, %v162_v38  ;;  %v1962_v43 = vld [vmem:[%s2364_s3 + $0x180] sm:$0xff]   ;;  %v1968_v44 = vld [vmem:[%s2364_s3 + $0x148] sm:$0xff]   ;;  %v1992_v48 = vld [vmem:[%s2364_s3 + $0x150] sm:$0xff]  }
   0xf   :  { %v1974_v45 = vld [vmem:[%s2364_s3 + $0x1c8] sm:$0xff]   ;;  %v1998_v49 = vld [vmem:[%s2364_s3 + $0x1d0] sm:$0xff]   ;;  %v2016_v52 = vld [vmem:[%s2364_s3 + $0x158] sm:$0xff]  }
  0x10   :  { %1315 = vmatpush3.bf16.msra.mxu0 %v1824_v14  ;;  %638 = vmatprep.mubr.bf16.mxu1 %v171_v36  ;;  %v1980_v46 = vld [vmem:[%s2364_s3 + $0x108] sm:$0xff]   ;;  %v2004_v50 = vld [vmem:[%s2364_s3 + $0x110] sm:$0xff]   ;;  %v2022_v53 = vld [vmem:[%s2364_s3 + $0x1d8] sm:$0xff]  }
  0x11   :  { %1337 = vmatpush3.bf16.msra.mxu1 %v1830_v15  ;;  %1316 = vmatprep.subr.bf16.mxu0 %v1836_v16  ;;  %v1986_v47 = vld [vmem:[%s2364_s3 + $0x188] sm:$0xff]   ;;  %v2010_v51 = vld [vmem:[%s2364_s3 + $0x190] sm:$0xff]   ;;  %v2028_v54 = vld [vmem:[%s2364_s3 + $0x118] sm:$0xff]  }
  0x12   :  { %1338 = vmatprep.subr.bf16.mxu1 %v1842_v17  ;;  %v2034_v55 = vld [vmem:[%s2364_s3 + $0x198] sm:$0xff]   ;;  %v2040_v56 = vld [vmem:[%s2364_s3 + $0x160] sm:$0xff]   ;;  %v2064_v60 = vld [vmem:[%s2364_s3 + $0x168] sm:$0xff]  }
  0x13   :  { %v2046_v57 = vld [vmem:[%s2364_s3 + $0x1e0] sm:$0xff]   ;;  %v2070_v61 = vld [vmem:[%s2364_s3 + $0x1e8] sm:$0xff]   ;;  %v2088_v32 = vld [vmem:[%s2364_s3 + $0x170] sm:$0xff]  }
  0x14   :  { %1317 = vmatpush3.bf16.msra.mxu0 %v1848_v18  ;;  %v2052_v58 = vld [vmem:[%s2364_s3 + $0x120] sm:$0xff]   ;;  %2395 = vst [vmem:[#allocation2_spill] sm:$0xff] %v2070_v61  ;;  %v2076_v62 = vld [vmem:[%s2364_s3 + $0x128] sm:$0xff]   ;;  %2398 = vst [vmem:[#allocation5_spill] sm:$0xff] %v2088_v32 }
  0x15   :  { %1339 = vmatpush3.bf16.msra.mxu1 %v1854_v19  ;;  %1318 = vmatprep.subr.bf16.mxu0 %v1860_v20  ;;  %v2058_v59 = vld [vmem:[%s2364_s3 + $0x1a0] sm:$0xff]   ;;  %2396 = vst [vmem:[#allocation3_spill] sm:$0xff] %v2076_v62  ;;  %v2082_v63 = vld [vmem:[%s2364_s3 + $0x1a8] sm:$0xff]   ;;  %v2094_v33 = vld [vmem:[%s2364_s3 + $0x1f0] sm:$0xff]  }
  0x16   :  { %1340 = vmatprep.subr.bf16.mxu1 %v1866_v21  ;;  %2397 = vst [vmem:[#allocation4_spill] sm:$0xff] %v2082_v63  ;;  %2399 = vst [vmem:[#allocation6_spill] sm:$0xff] %v2094_v33  ;;  %v2100_v34 = vld [vmem:[%s2364_s3 + $0x130] sm:$0xff]   ;;  %v2112_v36 = vld [vmem:[%s2364_s3 + $0x178] sm:$0xff]  }
  0x17   :  { %2400 = vst [vmem:[#allocation7_spill] sm:$0xff] %v2100_v34  ;;  %v2106_v35 = vld [vmem:[%s2364_s3 + $0x1b0] sm:$0xff]   ;;  %2402 = vst [vmem:[#allocation9_spill] sm:$0xff] %v2112_v36  ;;  %v2124_v38 = vld [vmem:[%s2364_s3 + $0x138] sm:$0xff]  }
  0x18   :  { %1319 = vmatpush3.bf16.msra.mxu0 %v1872_v22  ;;  %2401 = vst [vmem:[#allocation8_spill] sm:$0xff] %v2106_v35  ;;  %2404 = vst [vmem:[#allocation11_spill] sm:$0xff] %v2124_v38 }
  0x19   :  { %1341 = vmatpush3.bf16.msra.mxu1 %v1878_v23  ;;  %1320 = vmatprep.subr.bf16.mxu0 %v1884_v24 }
  0x1a   :  { %1342 = vmatprep.subr.bf16.mxu1 %v1890_v25 }
  0x1c   :  { %1321 = vmatpush3.bf16.msra.mxu0 %v1896_v26 }
  0x1d   :  { %1343 = vmatpush3.bf16.msra.mxu1 %v1902_v27  ;;  %1322 = vmatprep.subr.bf16.mxu0 %v1908_v28 }
  0x1e   :  { %1344 = vmatprep.subr.bf16.mxu1 %v1914_v29 }
  0x20   :  { %1323 = vmatpush3.bf16.msra.mxu0 %v1920_v30 }
  0x21   :  { %1345 = vmatpush3.bf16.msra.mxu1 %v1926_v31  ;;  %1352 = vmatprep.subr.bf16.mxu0 %v1945_v40 }
  0x22   :  { %1374 = vmatprep.subr.bf16.mxu1 %v1950_v41 }
  0x23   :  { %599 = vmatmul.mubr.bf16.vlgmr.msra.gmra.mrb[0].mxu0 %v168_v37  ;;  %v2118_v37 = vld [vmem:[%s2364_s3 + $0x1f8] sm:$0xff]  }
  0x24   :  { %639 = vmatmul.mubr.bf16.vlgmr.msra.gmra.mrb[0].mxu1 %v170_v39  ;;  %1353 = vmatpush3.bf16.msra.mxu0 %v1955_v42  ;;  %2403 = vst [vmem:[#allocation10_spill] sm:$0xff] %v2118_v37  ;;  %v2130_v39 = vld [vmem:[%s2364_s3 + $0x1b8] sm:$0xff]  }
  0x25   :  { %1375 = vmatpush3.bf16.msra.mxu1 %v1962_v43  ;;  %1354 = vmatprep.subr.bf16.mxu0 %v1968_v44 }
  0x26   :  { %1376 = vmatprep.subr.bf16.mxu1 %v1974_v45 }
  0x28   :  { %1355 = vmatpush3.bf16.msra.mxu0 %v1980_v46 }
  0x29   :  { %1377 = vmatpush3.bf16.msra.mxu1 %v1986_v47  ;;  %1356 = vmatprep.subr.bf16.mxu0 %v1992_v48 }
  0x2a   :  { %1378 = vmatprep.subr.bf16.mxu1 %v1998_v49 }
  0x2c   :  { %1357 = vmatpush3.bf16.msra.mxu0 %v2004_v50 }
  0x2d   :  { %1379 = vmatpush3.bf16.msra.mxu1 %v2010_v51  ;;  %1358 = vmatprep.subr.bf16.mxu0 %v2016_v52 }
  0x2e   :  { %1380 = vmatprep.subr.bf16.mxu1 %v2022_v53 }
  0x30   :  { %1359 = vmatpush3.bf16.msra.mxu0 %v2028_v54 }
  0x31   :  { %1381 = vmatpush3.bf16.msra.mxu1 %v2034_v55  ;;  %1360 = vmatprep.subr.bf16.mxu0 %v2040_v56 }
  0x32   :  { %1382 = vmatprep.subr.bf16.mxu1 %v2046_v57 }
  0x34   :  { %1361 = vmatpush3.bf16.msra.mxu0 %v2052_v58 }
  0x35   :  { %1383 = vmatpush3.bf16.msra.mxu1 %v2058_v59  ;;  %1362 = vmatprep.subr.bf16.mxu0 %v2064_v60 }
  0x36   :  { %1384 = vmatprep.subr.bf16.mxu1 %v2070_v61 }
  0x38   :  { %1363 = vmatpush3.bf16.msra.mxu0 %v2076_v62 }
  0x39   :  { %1385 = vmatpush3.bf16.msra.mxu1 %v2082_v63  ;;  %1364 = vmatprep.subr.bf16.mxu0 %v2088_v32  ;;  %v166_v32 = vld [vmem:[%s2365_s0 + $0x30] sm:$0xff]  ;;  %v734_v63 = vld [vmem:[%s2366_s1 + $0x8] sm:$0xff] }
  0x3a   :  { %1386 = vmatprep.subr.bf16.mxu1 %v2094_v33  ;;  %v174_v61 = vpack.c.bf16 %v166_v32, %v166_v32  ;;  %v738_v32 = vld [vmem:[%s2366_s1 + $0x28] sm:$0xff] }
  0x3c   :  { %1365 = vmatpush3.bf16.msra.mxu0 %v2100_v34 }
  0x3d   :  { %1387 = vmatpush3.bf16.msra.mxu1 %v2106_v35  ;;  %1366 = vmatprep.subr.bf16.mxu0 %v2112_v36  ;;  %v165_v35 = vld [vmem:[%s2365_s0 + $0x28] sm:$0xff]  ;;  %v167_v36 = vld [vmem:[%s2365_s0 + $0x38] sm:$0xff] }
  0x3e   :  { %1388 = vmatprep.subr.bf16.mxu1 %v2118_v37  ;;  %v173_v34 = vpack.c.bf16 %v165_v35, %v165_v35  ;;  %v175_v33 = vpack.c.bf16 %v167_v36, %v167_v36  ;;  %v164_v37 = vld [vmem:[%s2365_s0 + $0x20] sm:$0xff]  ;;  %v736_v35 = vld [vmem:[%s2366_s1 + $0x18] sm:$0xff]  ;;  %v742_v36 = vpack.c.bf16 %v734_v63, %v734_v63 }
  0x3f   :  { %v172_v62 = vpack.c.bf16 %v164_v37, %v164_v37  ;;  %v746_v37 = vpack.c.bf16 %v738_v32, %v738_v32  ;;  %v2410_v32 = vld [vmem:[#allocation7_spill] sm:$0xff] }
  0x40   :  { %1367 = vmatpush3.bf16.msra.mxu0 %v2124_v38  ;;  %678 = vmatprep.mubr.bf16.mxu0 %v173_v34  ;;  %v744_v38 = vpack.c.bf16 %v736_v35, %v736_v35  ;;  %v740_v34 = vld [vmem:[%s2366_s1 + $0x38] sm:$0xff]  ;;  %v2405_v35 = vld [vmem:[#allocation2_spill] sm:$0xff] }
  0x41   :  { %1389 = vmatpush3.bf16.msra.mxu1 %v2130_v39  ;;  %1396 = vmatprep.subr.bf16.mxu0 %v1741_v0 }
  0x42   :  { %718 = vmatprep.mubr.bf16.mxu1 %v175_v33  ;;  %1418 = vmatprep.subr.bf16.mxu1 %v1746_v1 }
  0x43   :  { %679 = vmatmul.mubr.bf16.vlgmr.msra.gmra.mrb[4].mxu0 %v172_v62  ;;  %v735_v62 = vld [vmem:[%s2366_s1 + $0x10] sm:$0xff] }
  0x44   :  { %719 = vmatmul.mubr.bf16.vlgmr.msra.gmra.mrb[4].mxu1 %v174_v61  ;;  %1397 = vmatpush3.bf16.msra.mxu0 %v1752_v2  ;;  %v733_v61 = vld [vmem:[%s2366_s1] sm:$0xff]  ;;  %v743_v33 = vpack.c.bf16 %v735_v62, %v735_v62  ;;  %v2408_v62 = vld [vmem:[#allocation5_spill] sm:$0xff] }
  0x45   :  { %1419 = vmatpush3.bf16.msra.mxu1 %v1758_v3  ;;  %1398 = vmatprep.subr.bf16.mxu0 %v1764_v4  ;;  %v741_v63 = vpack.c.bf16 %v733_v61, %v733_v61  ;;  %v2407_v61 = vld [vmem:[#allocation4_spill] sm:$0xff] }
  0x46   :  { %1420 = vmatprep.subr.bf16.mxu1 %v1770_v5  ;;  %781 = vmatprep.mubr.bf16.mxu0 %v742_v36  ;;  %v2406_v36 = vld [vmem:[#allocation3_spill] sm:$0xff] }
  0x47   :  { %821 = vmatprep.mubr.bf16.mxu1 %v744_v38  ;;  %v748_v38 = vpack.c.bf16 %v740_v34, %v740_v34  ;;  %v2411_v34 = vld [vmem:[#allocation8_spill] sm:$0xff] }
  0x48   :  { %1399 = vmatpush3.bf16.msra.mxu0 %v1776_v6 }
  0x49   :  { %1421 = vmatpush3.bf16.msra.mxu1 %v1782_v7  ;;  %1400 = vmatprep.subr.bf16.mxu0 %v1788_v8 }
  0x4a   :  { %1422 = vmatprep.subr.bf16.mxu1 %v1794_v9 }
  0x4c   :  { %1401 = vmatpush3.bf16.msra.mxu0 %v1800_v10 }
  0x4d   :  { %1423 = vmatpush3.bf16.msra.mxu1 %v1806_v11  ;;  %1402 = vmatprep.subr.bf16.mxu0 %v1812_v12 }
  0x4e   :  { %1424 = vmatprep.subr.bf16.mxu1 %v1818_v13 }
  0x50   :  { %1403 = vmatpush3.bf16.msra.mxu0 %v1824_v14 }
  0x51   :  { %1425 = vmatpush3.bf16.msra.mxu1 %v1830_v15  ;;  %1404 = vmatprep.subr.bf16.mxu0 %v1836_v16 }
  0x52   :  { %1426 = vmatprep.subr.bf16.mxu1 %v1842_v17 }
  0x54   :  { %1405 = vmatpush3.bf16.msra.mxu0 %v1848_v18 }
  0x55   :  { %1427 = vmatpush3.bf16.msra.mxu1 %v1854_v19  ;;  %1406 = vmatprep.subr.bf16.mxu0 %v1860_v20 }
  0x56   :  { %1428 = vmatprep.subr.bf16.mxu1 %v1866_v21 }
  0x58   :  { %1407 = vmatpush3.bf16.msra.mxu0 %v1872_v22 }
  0x59   :  { %1429 = vmatpush3.bf16.msra.mxu1 %v1878_v23  ;;  %1408 = vmatprep.subr.bf16.mxu0 %v1884_v24 }
  0x5a   :  { %1430 = vmatprep.subr.bf16.mxu1 %v1890_v25 }
  0x5c   :  { %1409 = vmatpush3.bf16.msra.mxu0 %v1896_v26 }
  0x5d   :  { %1431 = vmatpush3.bf16.msra.mxu1 %v1902_v27  ;;  %1410 = vmatprep.subr.bf16.mxu0 %v1908_v28 }
  0x5e   :  { %1432 = vmatprep.subr.bf16.mxu1 %v1914_v29 }
  0x60   :  { %1411 = vmatpush3.bf16.msra.mxu0 %v1920_v30 }
  0x61   :  { %1433 = vmatpush3.bf16.msra.mxu1 %v1926_v31  ;;  %1440 = vmatprep.subr.bf16.mxu0 %v1945_v40 }
  0x62   :  { %1462 = vmatprep.subr.bf16.mxu1 %v1950_v41 }
  0x63   :  { %782 = vmatmul.mubr.bf16.vlgmr.msra.gmra.mrb[8].mxu0 %v741_v63  ;;  %v2409_v63 = vld [vmem:[#allocation6_spill] sm:$0xff] }
  0x64   :  { %822 = vmatmul.mubr.bf16.vlgmr.msra.gmra.mrb[8].mxu1 %v743_v33  ;;  %1441 = vmatpush3.bf16.msra.mxu0 %v1955_v42  ;;  %v737_v33 = vld [vmem:[%s2366_s1 + $0x20] sm:$0xff] }
  0x65   :  { %1463 = vmatpush3.bf16.msra.mxu1 %v1962_v43  ;;  %1442 = vmatprep.subr.bf16.mxu0 %v1968_v44 }
  0x66   :  { %1464 = vmatprep.subr.bf16.mxu1 %v1974_v45  ;;  %861 = vmatprep.mubr.bf16.mxu0 %v746_v37  ;;  %v2412_v37 = vld [vmem:[#allocation9_spill] sm:$0xff] }
  0x67   :  { %901 = vmatprep.mubr.bf16.mxu1 %v748_v38  ;;  %v739_v38 = vld [vmem:[%s2366_s1 + $0x30] sm:$0xff] }
  0x68   :  { %1443 = vmatpush3.bf16.msra.mxu0 %v1980_v46 }
  0x69   :  { %1465 = vmatpush3.bf16.msra.mxu1 %v1986_v47  ;;  %1444 = vmatprep.subr.bf16.mxu0 %v1992_v48 }
  0x6a   :  { %1466 = vmatprep.subr.bf16.mxu1 %v1998_v49 }
  0x6c   :  { %1445 = vmatpush3.bf16.msra.mxu0 %v2004_v50 }
  0x6d   :  { %1467 = vmatpush3.bf16.msra.mxu1 %v2010_v51  ;;  %1446 = vmatprep.subr.bf16.mxu0 %v2016_v52 }
  0x6e   :  { %1468 = vmatprep.subr.bf16.mxu1 %v2022_v53 }
  0x70   :  { %1447 = vmatpush3.bf16.msra.mxu0 %v2028_v54 }
  0x71   :  { %1469 = vmatpush3.bf16.msra.mxu1 %v2034_v55  ;;  %1448 = vmatprep.subr.bf16.mxu0 %v2040_v56 }
  0x72   :  { %1470 = vmatprep.subr.bf16.mxu1 %v2046_v57 }
  0x74   :  { %1449 = vmatpush3.bf16.msra.mxu0 %v2052_v58 }
  0x75   :  { %1471 = vmatpush3.bf16.msra.mxu1 %v2058_v59  ;;  %1450 = vmatprep.subr.bf16.mxu0 %v2064_v60 }
  0x76   :  { %1472 = vmatprep.subr.bf16.mxu1 %v2405_v35 }
  0x78   :  { %1451 = vmatpush3.bf16.msra.mxu0 %v2406_v36  ;;  %v2413_v36 = vld [vmem:[#allocation10_spill] sm:$0xff] }
  0x79   :  { %1473 = vmatpush3.bf16.msra.mxu1 %v2407_v61  ;;  %1452 = vmatprep.subr.bf16.mxu0 %v2408_v62  ;;  %v745_v61 = vpack.c.bf16 %v737_v33, %v737_v33  ;;  %v747_v62 = vpack.c.bf16 %v739_v38, %v739_v38 }
  0x7a   :  { %1474 = vmatprep.subr.bf16.mxu1 %v2409_v63  ;;  %v917_v63 = vld [vmem:[%s2368_s2 + $0x8] sm:$0xff] }
  0x7c   :  { %1453 = vmatpush3.bf16.msra.mxu0 %v2410_v32  ;;  %v2414_v32 = vld [vmem:[#allocation11_spill] sm:$0xff] }
  0x7d   :  { %1475 = vmatpush3.bf16.msra.mxu1 %v2411_v34  ;;  %1454 = vmatprep.subr.bf16.mxu0 %v2412_v37  ;;  %v919_v34 = vld [vmem:[%s2368_s2 + $0x18] sm:$0xff]  ;;  %v925_v37 = vpack.c.bf16 %v917_v63, %v917_v63 }
  0x7e   :  { %1476 = vmatprep.subr.bf16.mxu1 %v2413_v36  ;;  %v927_v33 = vpack.c.bf16 %v919_v34, %v919_v34 }
  0x80   :  { %1455 = vmatpush3.bf16.msra.mxu0 %v2414_v32 }
  0x81   :  { %1477 = vmatpush3.bf16.msra.mxu1 %v2130_v39  ;;  %1484 = vmatprep.subr.bf16.mxu0 %v1741_v0  ;;  %v916_v0 = vld [vmem:[%s2368_s2] sm:$0xff] }
  0x82   :  { %1506 = vmatprep.subr.bf16.mxu1 %v1746_v1  ;;  %v918_v1 = vld [vmem:[%s2368_s2 + $0x10] sm:$0xff] }
  0x83   :  { %862 = vmatmul.mubr.bf16.vlgmr.msra.gmra.mrb[12].mxu0 %v745_v61 }
  0x84   :  { %902 = vmatmul.mubr.bf16.vlgmr.msra.gmra.mrb[12].mxu1 %v747_v62  ;;  %1485 = vmatpush3.bf16.msra.mxu0 %v1752_v2  ;;  %v924_v2 = vpack.c.bf16 %v916_v0, %v916_v0 }
  0x85   :  { %1507 = vmatpush3.bf16.msra.mxu1 %v1758_v3  ;;  %1486 = vmatprep.subr.bf16.mxu0 %v1764_v4  ;;  %v921_v3 = vld [vmem:[%s2368_s2 + $0x28] sm:$0xff]  ;;  %v926_v4 = vpack.c.bf16 %v918_v1, %v918_v1 }
  0x86   :  { %1508 = vmatprep.subr.bf16.mxu1 %v1770_v5  ;;  %964 = vmatprep.mubr.bf16.mxu0 %v925_v37  ;;  %v923_v5 = vld [vmem:[%s2368_s2 + $0x38] sm:$0xff] }
  0x87   :  { %1004 = vmatprep.mubr.bf16.mxu1 %v927_v33 }
  0x88   :  { %1487 = vmatpush3.bf16.msra.mxu0 %v1776_v6  ;;  %v929_v6 = vpack.c.bf16 %v921_v3, %v921_v3 }
  0x89   :  { %1509 = vmatpush3.bf16.msra.mxu1 %v1782_v7  ;;  %1488 = vmatprep.subr.bf16.mxu0 %v1788_v8  ;;  %v931_v7 = vpack.c.bf16 %v923_v5, %v923_v5  ;;  %v2415_v8 = vld [vmem:[#allocation3_spill] sm:$0xff] }
  0x8a   :  { %1510 = vmatprep.subr.bf16.mxu1 %v1794_v9  ;;  %v2416_v9 = vld [vmem:[#allocation4_spill] sm:$0xff] }
  0x8c   :  { %1489 = vmatpush3.bf16.msra.mxu0 %v1800_v10  ;;  %v2417_v10 = vld [vmem:[#allocation5_spill] sm:$0xff] }
  0x8d   :  { %1511 = vmatpush3.bf16.msra.mxu1 %v1806_v11  ;;  %1490 = vmatprep.subr.bf16.mxu0 %v1812_v12  ;;  %v2418_v11 = vld [vmem:[#allocation6_spill] sm:$0xff]  ;;  %v2419_v12 = vld [vmem:[#allocation7_spill] sm:$0xff] }
  0x8e   :  { %1512 = vmatprep.subr.bf16.mxu1 %v1818_v13  ;;  %v920_v13 = vld [vmem:[%s2368_s2 + $0x20] sm:$0xff] }
  0x90   :  { %1491 = vmatpush3.bf16.msra.mxu0 %v1824_v14  ;;  %v2420_v14 = vld [vmem:[#allocation8_spill] sm:$0xff] }
  0x91   :  { %1513 = vmatpush3.bf16.msra.mxu1 %v1830_v15  ;;  %1492 = vmatprep.subr.bf16.mxu0 %v1836_v16  ;;  %v2421_v15 = vld [vmem:[#allocation9_spill] sm:$0xff]  ;;  %v922_v16 = vld [vmem:[%s2368_s2 + $0x30] sm:$0xff] }
  0x92   :  { %1514 = vmatprep.subr.bf16.mxu1 %v1842_v17  ;;  %v928_v17 = vpack.c.bf16 %v920_v13, %v920_v13 }
  0x94   :  { %1493 = vmatpush3.bf16.msra.mxu0 %v1848_v18  ;;  %v930_v18 = vpack.c.bf16 %v922_v16, %v922_v16 }
  0x95   :  { %1515 = vmatpush3.bf16.msra.mxu1 %v1854_v19  ;;  %1494 = vmatprep.subr.bf16.mxu0 %v1860_v20  ;;  %v1667_v19 = vld [vmem:[%s2367_s5] sm:$0xff]   ;;  %v1681_v20 = vmov 0.0  }
  0x96   :  { %1516 = vmatprep.subr.bf16.mxu1 %v1866_v21  ;;  %v1668_v21 = vld [vmem:[%s2367_s5 + $0x8] sm:$0xff]  }
  0x98   :  { %1495 = vmatpush3.bf16.msra.mxu0 %v1872_v22  ;;  %v1669_v22 = vld [vmem:[%s2367_s5 + $0x10] sm:$0xff]  }
  0x99   :  { %1517 = vmatpush3.bf16.msra.mxu1 %v1878_v23  ;;  %1496 = vmatprep.subr.bf16.mxu0 %v1884_v24  ;;  %v1670_v23 = vld [vmem:[%s2367_s5 + $0x18] sm:$0xff]   ;;  %v1671_v24 = vld [vmem:[%s2367_s5 + $0x20] sm:$0xff]  }
  0x9a   :  { %1518 = vmatprep.subr.bf16.mxu1 %v1890_v25  ;;  %v1672_v25 = vld [vmem:[%s2367_s5 + $0x28] sm:$0xff]  }
  0x9c   :  { %1497 = vmatpush3.bf16.msra.mxu0 %v1896_v26  ;;  %v1673_v26 = vld [vmem:[%s2367_s5 + $0x30] sm:$0xff]  }
  0x9d   :  { %1519 = vmatpush3.bf16.msra.mxu1 %v1902_v27  ;;  %1498 = vmatprep.subr.bf16.mxu0 %v1908_v28  ;;  %v1674_v27 = vld [vmem:[%s2367_s5 + $0x38] sm:$0xff]  }
  0x9e   :  { %1520 = vmatprep.subr.bf16.mxu1 %v1914_v29 }
  0xa0   :  { %1499 = vmatpush3.bf16.msra.mxu0 %v1920_v30  ;;  %v1234_v30 = vld [vmem:[%s2369_s4] ss:$0 sm:$0xff] }
  0xa1   :  { %1521 = vmatpush3.bf16.msra.mxu1 %v1926_v31  ;;  %1528 = vmatprep.subr.bf16.mxu0 %v1945_v40 }
  0xa2   :  { %1550 = vmatprep.subr.bf16.mxu1 %v1950_v41 }
  0xa3   :  { %965 = vmatmul.mubr.bf16.vlgmr.msra.gmra.mrb[16].mxu0 %v924_v2 }
  0xa4   :  { %1005 = vmatmul.mubr.bf16.vlgmr.msra.gmra.mrb[16].mxu1 %v926_v4  ;;  %1529 = vmatpush3.bf16.msra.mxu0 %v1955_v42 }
  0xa5   :  { %1551 = vmatpush3.bf16.msra.mxu1 %v1962_v43  ;;  %1530 = vmatprep.subr.bf16.mxu0 %v1968_v44 }
  0xa6   :  { %1552 = vmatprep.subr.bf16.mxu1 %v1974_v45  ;;  %1044 = vmatprep.mubr.bf16.mxu0 %v929_v6 }
  0xa7   :  { %1084 = vmatprep.mubr.bf16.mxu1 %v931_v7 }
  0xa8   :  { %1531 = vmatpush3.bf16.msra.mxu0 %v1980_v46 }
  0xa9   :  { %1553 = vmatpush3.bf16.msra.mxu1 %v1986_v47  ;;  %1532 = vmatprep.subr.bf16.mxu0 %v1992_v48 }
  0xaa   :  { %1554 = vmatprep.subr.bf16.mxu1 %v1998_v49 }
  0xac   :  { %1533 = vmatpush3.bf16.msra.mxu0 %v2004_v50 }
  0xad   :  { %1555 = vmatpush3.bf16.msra.mxu1 %v2010_v51  ;;  %1534 = vmatprep.subr.bf16.mxu0 %v2016_v52 }
  0xae   :  { %1556 = vmatprep.subr.bf16.mxu1 %v2022_v53 }
  0xb0   :  { %1535 = vmatpush3.bf16.msra.mxu0 %v2028_v54 }
  0xb1   :  { %1557 = vmatpush3.bf16.msra.mxu1 %v2034_v55  ;;  %1536 = vmatprep.subr.bf16.mxu0 %v2040_v56 }
  0xb2   :  { %1558 = vmatprep.subr.bf16.mxu1 %v2046_v57 }
  0xb4   :  { %1537 = vmatpush3.bf16.msra.mxu0 %v2052_v58 }
  0xb5   :  { %1559 = vmatpush3.bf16.msra.mxu1 %v2058_v59  ;;  %1538 = vmatprep.subr.bf16.mxu0 %v2064_v60 }
  0xb6   :  { %1560 = vmatprep.subr.bf16.mxu1 %v2405_v35 }
  0xb8   :  { %1539 = vmatpush3.bf16.msra.mxu0 %v2415_v8 }
  0xb9   :  { %1561 = vmatpush3.bf16.msra.mxu1 %v2416_v9  ;;  %1540 = vmatprep.subr.bf16.mxu0 %v2417_v10 }
  0xba   :  { %1562 = vmatprep.subr.bf16.mxu1 %v2418_v11 }
  0xbc   :  { %1541 = vmatpush3.bf16.msra.mxu0 %v2419_v12 }
  0xbd   :  { %1563 = vmatpush3.bf16.msra.mxu1 %v2420_v14  ;;  %1542 = vmatprep.subr.bf16.mxu0 %v2421_v15 }
  0xbe   :  { %1564 = vmatprep.subr.bf16.mxu1 %v2413_v36 }
  0xc0   :  { %1543 = vmatpush3.bf16.msra.mxu0 %v2414_v32 }
  0xc1   :  { %1565 = vmatpush3.bf16.msra.mxu1 %v2130_v39  ;;  %1581 = vmatprep.subr.bf16.mxu0 %v1681_v20 }
  0xc3   :  { %1045 = vmatmul.mubr.bf16.vlgmr.msra.gmra.mrb[20].mxu0 %v928_v17 }
  0xc4   :  { %1085 = vmatmul.mubr.bf16.vlgmr.msra.gmra.mrb[20].mxu1 %v930_v18  ;;  %1582 = vmatpush3.bf16.msra.mxu0 %v1667_v19 }
  0xc5   :  { %1583 = vmatprep.subr.bf16.mxu0 %v1681_v20  ;;  %1597 = vmatprep.mubr.msk.bf16.mxu0 %vm1682_vm0, %v1681_v20 }
  0xc8   :  { %1584 = vmatpush3.bf16.msra.mxu0 %v1668_v21 }
  0xc9   :  { %1585 = vmatprep.subr.bf16.mxu0 %v1681_v20 }
  0xcc   :  { %1586 = vmatpush3.bf16.msra.mxu0 %v1669_v22 }
  0xcd   :  { %1587 = vmatprep.subr.bf16.mxu0 %v1681_v20 }
  0xd0   :  { %1588 = vmatpush3.bf16.msra.mxu0 %v1670_v23 }
  0xd1   :  { %1589 = vmatprep.subr.bf16.mxu0 %v1681_v20 }
  0xd4   :  { %1590 = vmatpush3.bf16.msra.mxu0 %v1671_v24 }
  0xd5   :  { %1591 = vmatprep.subr.bf16.mxu0 %v1681_v20 }
  0xd8   :  { %1592 = vmatpush3.bf16.msra.mxu0 %v1672_v25 }
  0xd9   :  { %1593 = vmatprep.subr.bf16.mxu0 %v1681_v20 }
  0xdc   :  { %1594 = vmatpush3.bf16.msra.mxu0 %v1673_v26 }
  0xdd   :  { %1595 = vmatprep.subr.bf16.mxu0 %v1681_v20 }
  0xe0   :  { %1596 = vmatpush3.bf16.msra.mxu0 %v1674_v27 }
  0xf6   :  { %v1324_v28 = vpop.f32.mrb[0].mxu0 }
  0xf7   :  { %v1346_v29 = vpop.f32.mrb[0].mxu1  ;;  %v1325_v31 = vpop.f32.mrb[1].mxu0 }
  0xf8   :  { %v1347_v40 = vpop.f32.mrb[1].mxu1  ;;  %v1326_v41 = vadd.f32 %v1325_v31, %v1324_v28  ;;  %v1327_v43 = vpop.f32.mrb[2].mxu0 }
  0xf9   :  { %v1348_v42 = vadd.f32 %v1347_v40, %v1346_v29  ;;  %v1349_v44 = vpop.f32.mrb[2].mxu1  ;;  %v1328_v45 = vpop.f32.mrb[3].mxu0 }
  0xfa   :  { %v1350_v46 = vpop.f32.mrb[3].mxu1  ;;  %v601_v47 = vadd.f32 %v1326_v41, %v1234_v30 }
  0xfc   :  { %v641_v48 = vadd.f32 %v1348_v42, %v601_v47 }
 0x116   :  { %v1368_v49 = vpop.f32.mrb[4].mxu0 }
 0x117   :  { %v1390_v50 = vpop.f32.mrb[4].mxu1  ;;  %v1369_v51 = vpop.f32.mrb[5].mxu0 }
 0x118   :  { %v1370_v52 = vadd.f32 %v1369_v51, %v1368_v49  ;;  %v1391_v53 = vpop.f32.mrb[5].mxu1  ;;  %v1371_v54 = vpop.f32.mrb[6].mxu0 }
 0x119   :  { %v1392_v55 = vadd.f32 %v1391_v53, %v1390_v50  ;;  %v1393_v56 = vpop.f32.mrb[6].mxu1  ;;  %v1372_v57 = vpop.f32.mrb[7].mxu0 }
 0x11a   :  { %v681_v58 = vadd.f32 %v1370_v52, %v641_v48  ;;  %v1394_v59 = vpop.f32.mrb[7].mxu1 }
 0x11c   :  { %v721_v60 = vadd.f32 %v1392_v55, %v681_v58  ;;  %v1299_v55 = vld [vmem:[%s2371_s6] ss:$0 sm:$0xff] }
 0x11e   :  { %v1105_v39 = vpack.c.bf16 %v721_v60, %v721_v60  ;;  %v726_v35 = vmul.f32 %v721_v60, %v721_v60 }
 0x120   :  { %1598 = vmatmul.mubr.bf16.vlgmr.msra.gmra.mrb[24].mxu0 %v1105_v39  ;;  %727 = vadd.xlane.f32.xlu0 %v726_v35 }
 0x136   :  { %v1412_v36 = vpop.f32.mrb[8].mxu0 }
 0x137   :  { %v1434_v61 = vpop.f32.mrb[8].mxu1  ;;  %v1413_v62 = vpop.f32.mrb[9].mxu0 }
 0x138   :  { %v1414_v63 = vadd.f32 %v1413_v62, %v1412_v36  ;;  %v1435_v32 = vpop.f32.mrb[9].mxu1  ;;  %v1415_v34 = vpop.f32.mrb[10].mxu0 }
 0x139   :  { %v1436_v37 = vadd.f32 %v1435_v32, %v1434_v61  ;;  %v1437_v38 = vpop.f32.mrb[10].mxu1  ;;  %v1416_v33 = vpop.f32.mrb[11].mxu0 }
 0x13a   :  { %v784_v0 = vadd.f32 %v1414_v63, %v1234_v30  ;;  %v1438_v1 = vpop.f32.mrb[11].mxu1 }
 0x13c   :  { %v824_v2 = vadd.f32 %v1436_v37, %v784_v0 }
 0x156   :  { %v1456_v3 = vpop.f32.mrb[12].mxu0 }
 0x157   :  { %v1478_v4 = vpop.f32.mrb[12].mxu1  ;;  %v1457_v5 = vpop.f32.mrb[13].mxu0 }
 0x158   :  { %v1458_v6 = vadd.f32 %v1457_v5, %v1456_v3  ;;  %v1479_v7 = vpop.f32.mrb[13].mxu1  ;;  %v1459_v8 = vpop.f32.mrb[14].mxu0 }
 0x159   :  { %v1480_v9 = vadd.f32 %v1479_v7, %v1478_v4  ;;  %v1481_v10 = vpop.f32.mrb[14].mxu1  ;;  %v1460_v11 = vpop.f32.mrb[15].mxu0 }
 0x15a   :  { %v864_v12 = vadd.f32 %v1458_v6, %v824_v2  ;;  %v1482_v13 = vpop.f32.mrb[15].mxu1 }
 0x15c   :  { %v904_v14 = vadd.f32 %v1480_v9, %v864_v12 }
 0x15e   :  { %v909_v15 = vmul.f32 %v904_v14, %v904_v14 }
 0x160   :  { %910 = vadd.xlane.f32.xlu0 %v909_v15 }
 0x176   :  { %v1500_v16 = vpop.f32.mrb[16].mxu0 }
 0x177   :  { %v1522_v17 = vpop.f32.mrb[16].mxu1  ;;  %v1501_v18 = vpop.f32.mrb[17].mxu0 }
 0x178   :  { %v1502_v19 = vadd.f32 %v1501_v18, %v1500_v16  ;;  %v1523_v20 = vpop.f32.mrb[17].mxu1  ;;  %v1503_v21 = vpop.f32.mrb[18].mxu0 }
 0x179   :  { %v1524_v22 = vadd.f32 %v1523_v20, %v1522_v17  ;;  %v1525_v23 = vpop.f32.mrb[18].mxu1  ;;  %v1504_v24 = vpop.f32.mrb[19].mxu0 }
 0x17a   :  { %v967_v25 = vadd.f32 %v1502_v19, %v1234_v30  ;;  %v1526_v26 = vpop.f32.mrb[19].mxu1 }
 0x17c   :  { %v1007_v27 = vadd.f32 %v1524_v22, %v967_v25 }
 0x196   :  { %v1544_v28 = vpop.f32.mrb[20].mxu0 }
 0x197   :  { %v1566_v29 = vpop.f32.mrb[20].mxu1  ;;  %v1545_v31 = vpop.f32.mrb[21].mxu0 }
 0x198   :  { %v1546_v40 = vadd.f32 %v1545_v31, %v1544_v28  ;;  %v1567_v41 = vpop.f32.mrb[21].mxu1  ;;  %v1547_v42 = vpop.f32.mrb[22].mxu0 }
 0x199   :  { %v1568_v43 = vadd.f32 %v1567_v41, %v1566_v29  ;;  %v1569_v44 = vpop.f32.mrb[22].mxu1  ;;  %v1548_v45 = vpop.f32.mrb[23].mxu0 }
 0x19a   :  { %v1047_v46 = vadd.f32 %v1546_v40, %v1007_v27  ;;  %v1570_v47 = vpop.f32.mrb[23].mxu1 }
 0x19c   :  { %v1087_v48 = vadd.f32 %v1568_v43, %v1047_v46 }
 0x19e   :  { %v1092_v49 = vmul.f32 %v1087_v48, %v1087_v48 }
 0x1a0   :  { %1093 = vadd.xlane.f32.xlu1 %v1092_v49 }
 0x1ad   :  { %v728_v50 = vpop.xlane.xlu0 %727 }
 0x1ae   :  { %1675 = vrsqrt.f32 %v728_v50  ;;  %vm729_vm1 = vcmp.gt.f32.partialorder %v728_v50, 0.0 }
 0x1b8   :  { %v1676_v51 = vpop.eup %1675 }
 0x1b9   :  { %v731_v30 = vsel %vm729_vm1, %v1676_v51, 0.0 }
 0x1ba   :  { %v732_v52 = vmul.f32 %v731_v30, %v721_v60 }
 0x1bc   :  { %v1099_v53 = vpack.c.bf16 %v732_v52, %v732_v52 }
 0x1be   :  { %1100 = vst [vmem:[%s2370_s7] sm:$0xf] %v1099_v53 }
 0x1ed   :  { %v911_v54 = vpop.xlane.xlu0 %910 }
 0x1ee   :  { %1677 = vrsqrt.f32 %v911_v54  ;;  %vm912_vm2 = vcmp.gt.f32.partialorder %v911_v54, 0.0 }
 0x1f3   :  { %v1211_v56 = vpop.f32.mrb[24].mxu0 }
 0x1f4   :  { %v1212_v57 = vadd.f32 %v1299_v55, %v1211_v56  ;;  %v1599_v58 = vpop.f32.mrb[25].mxu0 }
 0x1f5   :  { %v1214_v59 = vpop.f32.mrb[26].mxu0 }
 0x1f6   :  { %1217 = vst [vmem:[%s2372_s10] sm:$0xff] %v1212_v57  ;;  %v1600_v60 = vpop.f32.mrb[27].mxu0 }
 0x1f8   :  { %v1678_v39 = vpop.eup %1677 }
 0x1f9   :  { %v914_v35 = vsel %vm912_vm2, %v1678_v39, 0.0 }
 0x1fa   :  { %v915_v36 = vmul.f32 %v914_v35, %v904_v14 }
 0x1fc   :  { %v1101_v61 = vpack.c.bf16 %v915_v36, %v915_v36 }
 0x1fe   :  { %1102 = vst [vmem:[%s2373_s8] sm:$0xf] %v1101_v61 }
 0x22d   :  { %v1094_v62 = vpop.xlane.xlu1 %1093 }
 0x22e   :  { %1679 = vrsqrt.f32 %v1094_v62  ;;  %vm1095_vm3 = vcmp.gt.f32.partialorder %v1094_v62, 0.0 }
 0x238   :  { %v1680_v63 = vpop.eup %1679 }
 0x239   :  { %v1097_v32 = vsel %vm1095_vm3, %v1680_v63, 0.0 }
 0x23a   :  { %v1098_v34 = vmul.f32 %v1097_v32, %v1087_v48 }
 0x23c   :  { %v1103_v37 = vpack.c.bf16 %v1098_v34, %v1098_v34 }
 0x23e   :  { %1104 = vst [vmem:[%s2374_s9] sm:$0xf] %v1103_v37 }

</bundles_post_ra>
